<compile_context>
chip_gen: v7x
topology: tpu7x:2x2x1
jax: 0.10.0
libtpu: 0.0.40
codegen_flags: <defaults>
</compile_context>

<pallas_src>
import functools

import jax
import jax.numpy as jnp
from jax.experimental import pallas as pl
from jax.experimental.pallas import tpu as pltpu


def _cdiv(a, b):
    return -(-a // b)


def _round_up(a, b):
    return _cdiv(a, b) * b


def _chip_config():
    """Returns (num_tensorcores, default packed-row tile, VMEM budget bytes, prefer_bf16_mxu)."""
    try:
        kind = jax.devices()[0].device_kind.lower()
    except Exception:
        kind = ""
    if "v7" in kind:
        # 2 TCs, 64 MiB physical VMEM, 32 MiB scoped default -> stay well under it.
        return 2, 4096, 20 << 20, False
    if "v6" in kind:
        return 1, 2048, 24 << 20, False
    if "v5" in kind and ("lite" in kind or "5e" in kind):
        # 16 MiB scoped default; packing inflates MXU FLOPs so prefer bf16 matmul.
        return 1, 2048, 12 << 20, True
    return 1, 1024, 12 << 20, False


def _make_kernel(cast_dtype):
    def kernel(x_ref, w_ref, o_ref):
        x = x_ref[...]
        if cast_dtype is not None:
            x = x.astype(cast_dtype)
        o_ref[...] = jnp.dot(
            x, w_ref[...], preferred_element_type=jnp.float32
        ).astype(o_ref.dtype)

    return kernel


@functools.partial(jax.jit, static_argnames=("tm", "mxu_bf16"))
def predictor_forward(data, weight, *, tm=None, mxu_bf16=None):
    """Forward pass of Predictor: data @ weight.T.

    data:   (batch, seq, dim)  — feature dim last, like torch.nn.Linear input.
    weight: (num_types, dim)   — PyTorch Linear layout.
    returns (batch, seq, num_types), dtype of `data`.
    """
    batch, seq, dim = data.shape
    num_types = weight.shape[0]
    out_dtype = data.dtype

    num_tc, tm_default, vmem_budget, prefer_bf16 = _chip_config()
    if tm is None:
        tm = tm_default
    if mxu_bf16 is None:
        mxu_bf16 = prefer_bf16

    # ---- layout selection ---------------------------------------------------
    pack = num_types < 128 and 128 % num_types == 0
    if pack:
        P = 128 // num_types
        Kp = P * dim
        if Kp > 512:          # size-gate: huge Kp inflates tiles & MXU FLOPs by P
            pack = False
    if not pack:
        P = 1
        Kp = dim
    Np = P * num_types if pack else _round_up(num_types, 128)

    # ---- input view (at most one small pad, only when M % P != 0) ------------
    M = batch * seq
    x = data.reshape(M, dim)
    pad_rows = (-M) % P
    if pad_rows:
        x = jnp.pad(x, ((0, pad_rows), (0, 0)))
    Mp = (M + pad_rows) // P
    x = x.reshape(Mp, Kp)     # free row-major view

    # ---- weight (transpose folded into the block-diagonal construction) ------
    if pack:
        # w[p*dim + d, q*num_types + n] = (p == q) * weight[n, d]
        eye = jnp.eye(P, dtype=weight.dtype)
        w = jnp.einsum("pq,nd->pdqn", eye, weight).reshape(Kp, Np)
    else:
        w = weight.T
        if Np != num_types:
            w = jnp.pad(w, ((0, 0), (0, Np - num_types)))

    if mxu_bf16 and x.dtype == jnp.float32:
        w = w.astype(jnp.bfloat16)      # tiny array; cast is negligible
        cast_dtype = jnp.bfloat16       # x tile cast happens inside the kernel
    else:
        w = w.astype(x.dtype)
        cast_dtype = None

    # ---- tiling ---------------------------------------------------------------
    x_item = jnp.dtype(x.dtype).itemsize
    o_item = jnp.dtype(out_dtype).itemsize
    w_item = jnp.dtype(w.dtype).itemsize
    gran = 16 if (x_item == 2 or o_item == 2) else 8   # dtype-dependent sublane granule

    per_row = 2 * (Kp * x_item + Np * o_item)          # double-buffered x + out
    fixed = Kp * Np * w_item + (1 << 20)               # resident weight + slack
    tm_budget = max(gran, ((vmem_budget - fixed) // per_row) // gran * gran)
    tm_eff = _round_up(max(gran, min(tm, tm_budget, _round_up(Mp, gran))), gran)

    grid_m = _cdiv(Mp, tm_eff)
    if num_tc == 2 and grid_m % 2 == 1 and Mp > gran:
        # Split the real rows evenly across both TensorCores instead of adding a
        # phantom zero tile.
        half_tiles = _cdiv(grid_m, 2)
        tm_try = _round_up(_cdiv(Mp, 2 * half_tiles), gran)
        if tm_try >= gran:
            tm_eff = tm_try
            grid_m = _cdiv(Mp, tm_eff)

    out = pl.pallas_call(
        _make_kernel(cast_dtype),
        out_shape=jax.ShapeDtypeStruct((Mp, Np), out_dtype),
        grid_spec=pltpu.PrefetchScalarGridSpec(
            num_scalar_prefetch=0,
            grid=(grid_m,),
            in_specs=[
                pl.BlockSpec((tm_eff, Kp), lambda i: (i, 0)),   # streamed x tile
                pl.BlockSpec((Kp, Np), lambda i: (0, 0)),       # resident weight
            ],
            out_specs=pl.BlockSpec((tm_eff, Np), lambda i: (i, 0)),
        ),
        compiler_params=pltpu.CompilerParams(
            dimension_semantics=("parallel",),
        ),
    )(x, w)

    # ---- unpack (free views / single cheap slice) -----------------------------
    if pack:
        out = out.reshape(Mp * P, num_types)
        if pad_rows:
            out = out[:M]
    elif Np != num_types:
        out = out[:, :num_types]
    return out.reshape(batch, seq, num_types)


def init_predictor_weight(key, dim, num_types):
    """Deterministic xavier_normal_ init for nn.Linear(dim, num_types, bias=False).
    Weight shape follows PyTorch: (num_types, dim); std = sqrt(2/(fan_in+fan_out))."""
    std = (2.0 / (dim + num_types)) ** 0.5
    return std * jax.random.normal(key, (num_types, dim), dtype=jnp.float32)


if __name__ == "__main__":
    key = jax.random.PRNGKey(0)
    k_data, k_w, k_data2, k_w2 = jax.random.split(key, 4)

    batch, seq, dim, num_types = 2, 8, 32, 16
    data = jax.random.normal(k_data, (batch, seq, dim), dtype=jnp.float32)
    weight = init_predictor_weight(k_w, dim, num_types)
    ref = jnp.einsum("bsd,nd->bsn", data, weight)

    # f32 MXU path (packed layout, partial last block — no grid padding).
    out = jax.block_until_ready(predictor_forward(data, weight, mxu_bf16=False))
    assert out.shape == (batch, seq, num_types)
    assert jnp.allclose(out, ref, atol=1e-5, rtol=1e-5)

    # In-kernel bf16 MXU path (v5e perf fix): relaxed tolerance.
    out_bf16 = jax.block_until_ready(predictor_forward(data, weight, mxu_bf16=True))
    assert jnp.allclose(out_bf16, ref, atol=5e-2, rtol=5e-2)

    # Ragged row count (batch*seq not a multiple of the pack factor).
    data2 = jax.random.normal(k_data2, (3, 5, dim), dtype=jnp.float32)
    out2 = jax.block_until_ready(predictor_forward(data2, weight, mxu_bf16=False))
    ref2 = jnp.einsum("bsd,nd->bsn", data2, weight)
    assert out2.shape == (3, 5, num_types)
    assert jnp.allclose(out2, ref2, atol=1e-5, rtol=1e-5)

    # Non-packing fallback path (128 % num_types != 0 -> N padded to 128).
    weight3 = init_predictor_weight(k_w2, dim, 48)
    out3 = jax.block_until_ready(predictor_forward(data, weight3, mxu_bf16=False))
    ref3 = jnp.einsum("bsd,nd->bsn", data, weight3)
    assert out3.shape == (batch, seq, 48)
    assert jnp.allclose(out3, ref3, atol=1e-5, rtol=1e-5)

    print("KERNEL_OK")
</pallas_src>

<mosaic_0001>
module attributes {stable_mosaic.version = 11 : i64} {
  func.func @kernel(%arg0: i32, %arg1: memref<8x256xf32, #tpu.memory_space<vmem>>, %arg2: memref<256x128xf32, #tpu.memory_space<vmem>>, %arg3: memref<8x128xf32, #tpu.memory_space<vmem>>) attributes {dimension_semantics = [#tpu.dimension_semantics<parallel>], iteration_bounds = array<i64: 1>, scalar_prefetch = 0 : i64, scratch_operands = 0 : i64, tpu.core_type = #tpu.core_type<tc>, window_params = [{transform_indices = @transform_0, window_bounds = array<i64: 8, 256>}, {pipeline_mode = #tpu.pipeline_mode<synchronous>, transform_indices = @transform_1, window_bounds = array<i64: 256, 128>}, {transform_indices = @transform_2, window_bounds = array<i64: 8, 128>}]} {
    %c0 = arith.constant 0 : index
    %c0_0 = arith.constant 0 : index
    %0 = vector.load %arg1[%c0, %c0_0] : memref<8x256xf32, #tpu.memory_space<vmem>>, vector<8x256xf32>
    %c0_1 = arith.constant 0 : index
    %c0_2 = arith.constant 0 : index
    %1 = vector.load %arg2[%c0_1, %c0_2] : memref<256x128xf32, #tpu.memory_space<vmem>>, vector<256x128xf32>
    %cst = arith.constant dense<0.000000e+00> : vector<8x128xf32>
    %2 = tpu.matmul %0, %1, %cst {dimension_numbers = #tpu.dot_dimension_numbers<[1], [0], [0], [1], [0, 0, 1, 1], [], []>} : vector<8x256xf32>, vector<256x128xf32>, vector<8x128xf32> -> vector<8x128xf32>
    %c0_3 = arith.constant 0 : index
    %c0_4 = arith.constant 0 : index
    %3 = vector.load %arg3[%c0_3, %c0_4] : memref<8x128xf32, #tpu.memory_space<vmem>>, vector<8x128xf32>
    tpu.vector_store %arg3[%c0_3, %c0_4], %2 {strides = array<i32>} : memref<8x128xf32, #tpu.memory_space<vmem>>, vector<8x128xf32>,
    return
  }
  func.func @transform_0(%arg0: i32) -> (i32, i32) {
    %c0_i32 = arith.constant 0 : i32
    %c0_i32_0 = arith.constant 0 : i32
    return %arg0, %c0_i32 : i32, i32
  }
  func.func @transform_1(%arg0: i32) -> (i32, i32) {
    %c0_i32 = arith.constant 0 : i32
    %c0_i32_0 = arith.constant 0 : i32
    %c0_i32_1 = arith.constant 0 : i32
    return %c0_i32, %c0_i32_0 : i32, i32
  }
  func.func @transform_2(%arg0: i32) -> (i32, i32) {
    %c0_i32 = arith.constant 0 : i32
    %c0_i32_0 = arith.constant 0 : i32
    return %arg0, %c0_i32 : i32, i32
  }
}

</mosaic_0001>

<bundles_post_ra>
// kernel: predictor_forward.1
= control target key start
LH: loop header
LB: loop body
LE: loop exit
PB: predicated region body
PF: predicated region fallthrough
CT: control target
= control target key end

     0   :  { %s373_s0 = inlined_call_operand.vmem [shape: f32[2,256], index: 0, kind: input, shape index: {}]   ;;  %s374_s1 = inlined_call_operand.vmem [shape: f32[256,128], index: 1, kind: input, shape index: {}]   ;;  %s375_s2 = inlined_call_operand.vmem [shape: f32[2,128], index: 2, kind: output, shape index: {}]  }
   0x1   :  { %v31_v0 = vld [vmem:[%s374_s1 + $0x80] sm:$0xff]  ;;  %v32_v1 = vld [vmem:[%s374_s1 + $0x88] sm:$0xff]  ;;  %v33_v5 = vld [vmem:[%s374_s1 + $0x90] sm:$0xff] }
   0x2   :  { %v15_v2 = vld [vmem:[%s374_s1] sm:$0xff]  ;;  %v216_v3 = vpack.c.bf16 %v32_v1, %v31_v0  ;;  %v16_v4 = vld [vmem:[%s374_s1 + $0x8] sm:$0xff]  ;;  %v34_v6 = vld [vmem:[%s374_s1 + $0x98] sm:$0xff] }
   0x3   :  { %v218_v7 = vpack.c.bf16 %v16_v4, %v15_v2  ;;  %v220_v8 = vpack.c.bf16 %v34_v6, %v33_v5  ;;  %v17_v9 = vld [vmem:[%s374_s1 + $0x10] sm:$0xff]  ;;  %v18_v10 = vld [vmem:[%s374_s1 + $0x18] sm:$0xff]  ;;  %v35_v11 = vld [vmem:[%s374_s1 + $0xa0] sm:$0xff] }
   0x4   :  { %217 = vmatprep.subr.bf16.mxu0 %v216_v3  ;;  %v36_v12 = vld [vmem:[%s374_s1 + $0xa8] sm:$0xff]  ;;  %v222_v13 = vpack.c.bf16 %v18_v10, %v17_v9  ;;  %v19_v15 = vld [vmem:[%s374_s1 + $0x20] sm:$0xff]  ;;  %v37_v17 = vld [vmem:[%s374_s1 + $0xb0] sm:$0xff] }
   0x5   :  { %219 = vmatpush3.bf16.msra.mxu0 %v218_v7  ;;  %v224_v14 = vpack.c.bf16 %v36_v12, %v35_v11  ;;  %v20_v16 = vld [vmem:[%s374_s1 + $0x28] sm:$0xff]  ;;  %v38_v18 = vld [vmem:[%s374_s1 + $0xb8] sm:$0xff]  ;;  %v21_v21 = vld [vmem:[%s374_s1 + $0x30] sm:$0xff] }
   0x6   :  { %221 = vmatprep.subr.bf16.mxu0 %v220_v8  ;;  %v226_v19 = vpack.c.bf16 %v20_v16, %v19_v15  ;;  %v228_v20 = vpack.c.bf16 %v38_v18, %v37_v17  ;;  %v22_v22 = vld [vmem:[%s374_s1 + $0x38] sm:$0xff]  ;;  %v39_v23 = vld [vmem:[%s374_s1 + $0xc0] sm:$0xff]  ;;  %v40_v24 = vld [vmem:[%s374_s1 + $0xc8] sm:$0xff] }
   0x7   :  { %v230_v25 = vpack.c.bf16 %v22_v22, %v21_v21  ;;  %v251_v26 = vld.sshfl [vmem:[%s373_s0] sm:$0xff pattern:$0x76325410]  ;;  %v252_v27 = vld.sshfl [vmem:[%s373_s0 + $0x8] sm:$0xff pattern:$0x76325410]  ;;  %v232_v28 = vpack.c.bf16 %v40_v24, %v39_v23 }
   0x8   :  { %v23_v29 = vld [vmem:[%s374_s1 + $0x40] sm:$0xff]  ;;  %v24_v30 = vld [vmem:[%s374_s1 + $0x48] sm:$0xff]  ;;  %v41_v31 = vld [vmem:[%s374_s1 + $0xd0] sm:$0xff]  ;;  %v68_v34 = vcombine.high %v251_v26, %v252_v27  ;;  %v67_v51 = vcombine.low %v251_v26, %v252_v27 }
   0x9   :  { %223 = vmatpush3.bf16.msra.mxu0 %v222_v13  ;;  %v42_v32 = vld [vmem:[%s374_s1 + $0xd8] sm:$0xff]  ;;  %v234_v33 = vpack.c.bf16 %v24_v30, %v23_v29  ;;  %v25_v36 = vld [vmem:[%s374_s1 + $0x50] sm:$0xff]  ;;  %v43_v38 = vld [vmem:[%s374_s1 + $0xe0] sm:$0xff] }
   0xa   :  { %225 = vmatprep.subr.bf16.mxu0 %v224_v14  ;;  %v236_v35 = vpack.c.bf16 %v42_v32, %v41_v31  ;;  %v26_v37 = vld [vmem:[%s374_s1 + $0x58] sm:$0xff]  ;;  %v44_v39 = vld [vmem:[%s374_s1 + $0xe8] sm:$0xff]  ;;  %135 = vmatprep.mubr.f32.mxu0 %v68_v34  ;;  %v27_v42 = vld [vmem:[%s374_s1 + $0x60] sm:$0xff] }
   0xb   :  { %v238_v40 = vpack.c.bf16 %v26_v37, %v25_v36  ;;  %v240_v41 = vpack.c.bf16 %v44_v39, %v43_v38  ;;  %v28_v43 = vld [vmem:[%s374_s1 + $0x68] sm:$0xff]  ;;  %v45_v44 = vld [vmem:[%s374_s1 + $0xf0] sm:$0xff]  ;;  %v46_v45 = vld [vmem:[%s374_s1 + $0xf8] sm:$0xff] }
   0xc   :  { %v242_v46 = vpack.c.bf16 %v28_v43, %v27_v42  ;;  %v244_v47 = vpack.c.bf16 %v46_v45, %v45_v44  ;;  %v29_v48 = vld [vmem:[%s374_s1 + $0x70] sm:$0xff]  ;;  %v30_v49 = vld [vmem:[%s374_s1 + $0x78] sm:$0xff] }
   0xd   :  { %227 = vmatpush3.bf16.msra.mxu0 %v226_v19  ;;  %v246_v50 = vpack.c.bf16 %v30_v49, %v29_v48 }
   0xe   :  { %229 = vmatprep.subr.bf16.mxu0 %v228_v20 }
  0x11   :  { %231 = vmatpush3.bf16.msra.mxu0 %v230_v25 }
  0x12   :  { %233 = vmatprep.subr.bf16.mxu0 %v232_v28 }
  0x15   :  { %235 = vmatpush3.bf16.msra.mxu0 %v234_v33 }
  0x16   :  { %237 = vmatprep.subr.bf16.mxu0 %v236_v35 }
  0x19   :  { %239 = vmatpush3.bf16.msra.mxu0 %v238_v40 }
  0x1a   :  { %241 = vmatprep.subr.bf16.mxu0 %v240_v41 }
  0x1d   :  { %243 = vmatpush3.bf16.msra.mxu0 %v242_v46 }
  0x1e   :  { %245 = vmatprep.subr.bf16.mxu0 %v244_v47 }
  0x21   :  { %247 = vmatpush3.bf16.msra.mxu0 %v246_v50 }
  0x24   :  { %136 = vmatmul.mubr.f32.vlgmr.msra.gmra.mrb[0].mxu0 %v67_v51 }
  0xf7   :  { %v213_v52 = vpop.f32.mrb[0].mxu0 }
  0xf8   :  { %v214_v53 = vpop.f32.mrb[1].mxu0 }
  0xf9   :  { %v215_v54 = vadd.f32 %v214_v53, %v213_v52 }
  0xfb   :  { %141 = vst [vmem:[#allocation2] sm:$0xff] %v215_v54 }
 0x102   :  { %v159_v55 = vld [vmem:[#allocation2] sm:$0x3] }
 0x103   :  { %160 = vst [vmem:[%s375_s2] sm:$0x3] %v159_v55 }

</bundles_post_ra>
